<compile_context>
chip_gen: v6e
topology: v6e:2x2x1
jax: 0.10.0
libtpu: 0.0.40
codegen_flags: <defaults>
</compile_context>

<pallas_src>
import jax
import jax.numpy as jnp
from jax.experimental import pallas as pl
from jax.experimental.pallas import tpu as pltpu

N_STATES = 6
N_ACTIONS = 4
HIDDEN = 50

# Lane-dense padded hidden / action sizes used *inside VMEM only* (the HBM
# output is the narrow (b_pad, N_ACTIONS) array).
HIDDEN_PAD = 128
ACT_PAD = 128


def _round_up(n: int, m: int) -> int:
    return ((n + m - 1) // m) * m


def net_kernel(x_ref, w1_ref, b1_ref, w2_ref, b2_ref, out_ref):
    # fc1: (TB, 6) f32 @ (6, 128) f32 -> f32 on the MXU (zero-padded cols).
    h = jnp.dot(x_ref[...], w1_ref[...], preferred_element_type=jnp.float32)
    # Bias + ReLU in f32 on the VPU (padded lanes stay exactly 0).
    h = jnp.maximum(h + b1_ref[...], 0.0)
    # out: (TB, 128) @ (128, 128) -> f32; lane-dense shape for the MXU.
    y = jnp.dot(h, w2_ref[...], preferred_element_type=jnp.float32)
    # Store only the 4 real action columns (narrow HBM writeback).
    out_ref[...] = y[:, :N_ACTIONS] + b2_ref[...]


def prepare_params(w1, b1, w2, b2):
    """One-time padding/cast of the parameters (hoisted out of the call path).

    w1: (N_STATES, HIDDEN), b1: (HIDDEN,) or (1, HIDDEN),
    w2: (HIDDEN, N_ACTIONS), b2: (N_ACTIONS,) or (1, N_ACTIONS)
    (weights pre-transposed to (in, out); y = relu(x @ w1 + b1) @ w2 + b2).
    """
    w1p = jnp.zeros((N_STATES, HIDDEN_PAD), jnp.float32)
    w1p = w1p.at[:, :HIDDEN].set(w1.astype(jnp.float32))
    b1p = jnp.zeros((1, HIDDEN_PAD), jnp.float32)
    b1p = b1p.at[:, :HIDDEN].set(jnp.reshape(b1, (1, HIDDEN)).astype(jnp.float32))
    w2p = jnp.zeros((HIDDEN_PAD, ACT_PAD), jnp.float32)
    w2p = w2p.at[:HIDDEN, :N_ACTIONS].set(w2.astype(jnp.float32))
    b2p = jnp.reshape(b2, (1, N_ACTIONS)).astype(jnp.float32)
    return w1p, b1p, w2p, b2p


def _choose_tiling(B: int, tb: int):
    b8 = _round_up(B, 8)
    tb = _round_up(min(tb, b8), 8)
    # Ensure >= 2 grid steps when the batch allows it, so the "parallel" batch
    # axis actually shards across the 2 TensorCores on v7x.
    if b8 // tb < 2 and b8 >= 16:
        tb = _round_up(-(-b8 // 2), 8)
    b_pad = _round_up(B, tb)
    return tb, b_pad


def net_forward(x, params, *, tb=1024):
    """x: (B, N_STATES) f32; params = prepare_params(...). Returns (B, N_ACTIONS) f32."""
    w1p, b1p, w2p, b2p = params
    B = x.shape[0]
    tb, b_pad = _choose_tiling(B, tb)

    x = x.astype(jnp.float32)
    if b_pad != B:
        xp = jnp.zeros((b_pad, N_STATES), jnp.float32).at[:B].set(x)
    else:
        xp = x

    grid = (b_pad // tb,)

    flops = 2 * b_pad * (N_STATES * HIDDEN_PAD + HIDDEN_PAD * ACT_PAD)
    bytes_accessed = (xp.size * 4 + w1p.size * 4 + b1p.size * 4
                      + w2p.size * 4 + b2p.size * 4
                      + b_pad * N_ACTIONS * 4)

    out = pl.pallas_call(
        net_kernel,
        out_shape=jax.ShapeDtypeStruct((b_pad, N_ACTIONS), jnp.float32),
        grid_spec=pltpu.PrefetchScalarGridSpec(
            num_scalar_prefetch=0,
            grid=grid,
            in_specs=[
                # x streams over the batch grid axis.
                pl.BlockSpec((tb, N_STATES), lambda i: (i, 0)),
                # Weights / biases: constant index_map -> VMEM resident, one DMA.
                pl.BlockSpec((N_STATES, HIDDEN_PAD), lambda i: (0, 0)),
                pl.BlockSpec((1, HIDDEN_PAD), lambda i: (0, 0)),
                pl.BlockSpec((HIDDEN_PAD, ACT_PAD), lambda i: (0, 0)),
                pl.BlockSpec((1, N_ACTIONS), lambda i: (0, 0)),
            ],
            # Narrow output: only the 4 real action columns go back to HBM.
            out_specs=pl.BlockSpec((tb, N_ACTIONS), lambda i: (i, 0)),
        ),
        compiler_params=pltpu.CompilerParams(
            dimension_semantics=("parallel",),
        ),
        cost_estimate=pl.CostEstimate(
            flops=flops, transcendentals=0, bytes_accessed=bytes_accessed),
    )(xp, w1p, b1p, w2p, b2p)

    return out if b_pad == B else out[:B]


def init_params(key):
    # Mirrors the PyTorch init: weights ~ Normal(0, 0.1), stored pre-transposed
    # as (in_features, out_features) so the kernel computes y = x @ W + b.
    k1, k2, k3, k4 = jax.random.split(key, 4)
    w1 = (0.1 * jax.random.normal(k1, (HIDDEN, N_STATES), jnp.float32)).T   # (6, 50)
    b1 = 0.1 * jax.random.normal(k2, (1, HIDDEN), jnp.float32)
    w2 = (0.1 * jax.random.normal(k3, (N_ACTIONS, HIDDEN), jnp.float32)).T  # (50, 4)
    b2 = 0.1 * jax.random.normal(k4, (1, N_ACTIONS), jnp.float32)
    return w1, b1, w2, b2


if __name__ == "__main__":
    key = jax.random.PRNGKey(0)
    kx, kp = jax.random.split(key)

    B = 8  # small batch
    x = jax.random.normal(kx, (B, N_STATES), jnp.float32)
    w1, b1, w2, b2 = init_params(kp)

    params = prepare_params(w1, b1, w2, b2)  # pad/cast once, hoisted

    fwd = jax.jit(net_forward)
    actions_value = fwd(x, params)
    actions_value = jax.block_until_ready(actions_value)

    # Pure-JAX f32 reference.
    ref = jnp.maximum(x @ w1 + b1, 0.0) @ w2 + b2

    assert actions_value.shape == (B, N_ACTIONS)
    assert jnp.allclose(actions_value, ref, atol=2e-3, rtol=2e-3)

    print("KERNEL_OK")
</pallas_src>

<mosaic_0001>
module attributes {stable_mosaic.version = 11 : i64} {
  func.func @net_kernel(%arg0: i32, %arg1: memref<8x6xf32, #tpu.memory_space<vmem>>, %arg2: memref<6x128xf32, #tpu.memory_space<vmem>>, %arg3: memref<1x128xf32, #tpu.memory_space<vmem>>, %arg4: memref<128x128xf32, #tpu.memory_space<vmem>>, %arg5: memref<1x4xf32, #tpu.memory_space<vmem>>, %arg6: memref<8x4xf32, #tpu.memory_space<vmem>>) attributes {dimension_semantics = [#tpu.dimension_semantics<parallel>], iteration_bounds = array<i64: 1>, scalar_prefetch = 0 : i64, scratch_operands = 0 : i64, tpu.core_type = #tpu.core_type<tc>, window_params = [{transform_indices = @transform_0, window_bounds = array<i64: 8, 6>}, {pipeline_mode = #tpu.pipeline_mode<synchronous>, transform_indices = @transform_1, window_bounds = array<i64: 6, 128>}, {pipeline_mode = #tpu.pipeline_mode<synchronous>, transform_indices = @transform_2, window_bounds = array<i64: 1, 128>}, {pipeline_mode = #tpu.pipeline_mode<synchronous>, transform_indices = @transform_3, window_bounds = array<i64: 128, 128>}, {pipeline_mode = #tpu.pipeline_mode<synchronous>, transform_indices = @transform_4, window_bounds = array<i64: 1, 4>}, {transform_indices = @transform_5, window_bounds = array<i64: 8, 4>}]} {
    %c0 = arith.constant 0 : index
    %c0_0 = arith.constant 0 : index
    %0 = vector.load %arg1[%c0, %c0_0] : memref<8x6xf32, #tpu.memory_space<vmem>>, vector<8x6xf32>
    %c0_1 = arith.constant 0 : index
    %c0_2 = arith.constant 0 : index
    %1 = vector.load %arg2[%c0_1, %c0_2] : memref<6x128xf32, #tpu.memory_space<vmem>>, vector<6x128xf32>
    %cst = arith.constant dense<0.000000e+00> : vector<8x128xf32>
    %2 = tpu.matmul %0, %1, %cst {dimension_numbers = #tpu.dot_dimension_numbers<[1], [0], [0], [1], [0, 0, 1, 1], [], []>} : vector<8x6xf32>, vector<6x128xf32>, vector<8x128xf32> -> vector<8x128xf32>
    %c0_3 = arith.constant 0 : index
    %c0_4 = arith.constant 0 : index
    %3 = vector.load %arg3[%c0_3, %c0_4] : memref<1x128xf32, #tpu.memory_space<vmem>>, vector<1x128xf32>
    %4 = vector.broadcast %3 : vector<1x128xf32> to vector<8x128xf32>
    %5 = arith.addf %2, %4 : vector<8x128xf32>
    %cst_5 = arith.constant 0.000000e+00 : f32
    %6 = vector.broadcast %cst_5 : f32 to vector<8x128xf32>
    %7 = arith.maximumf %5, %6 : vector<8x128xf32>
    %c0_6 = arith.constant 0 : index
    %c0_7 = arith.constant 0 : index
    %8 = vector.load %arg4[%c0_6, %c0_7] : memref<128x128xf32, #tpu.memory_space<vmem>>, vector<128x128xf32>
    %cst_8 = arith.constant dense<0.000000e+00> : vector<8x128xf32>
    %9 = tpu.matmul %7, %8, %cst_8 {dimension_numbers = #tpu.dot_dimension_numbers<[1], [0], [0], [1], [0, 0, 1, 1], [], []>} : vector<8x128xf32>, vector<128x128xf32>, vector<8x128xf32> -> vector<8x128xf32>
    %10 = vector.extract_strided_slice %9 {offsets = [0, 0], sizes = [8, 4], strides = [1, 1]} : vector<8x128xf32> to vector<8x4xf32>
    %c0_9 = arith.constant 0 : index
    %c0_10 = arith.constant 0 : index
    %11 = vector.load %arg5[%c0_9, %c0_10] : memref<1x4xf32, #tpu.memory_space<vmem>>, vector<1x4xf32>
    %12 = vector.broadcast %11 : vector<1x4xf32> to vector<8x4xf32>
    %13 = arith.addf %10, %12 : vector<8x4xf32>
    %c0_11 = arith.constant 0 : index
    %c0_12 = arith.constant 0 : index
    %14 = vector.load %arg6[%c0_11, %c0_12] : memref<8x4xf32, #tpu.memory_space<vmem>>, vector<8x4xf32>
    tpu.vector_store %arg6[%c0_11, %c0_12], %13 {strides = array<i32>} : memref<8x4xf32, #tpu.memory_space<vmem>>, vector<8x4xf32>,
    return
  }
  func.func @transform_0(%arg0: i32) -> (i32, i32) {
    %c0_i32 = arith.constant 0 : i32
    %c0_i32_0 = arith.constant 0 : i32
    return %arg0, %c0_i32 : i32, i32
  }
  func.func @transform_1(%arg0: i32) -> (i32, i32) {
    %c0_i32 = arith.constant 0 : i32
    %c0_i32_0 = arith.constant 0 : i32
    %c0_i32_1 = arith.constant 0 : i32
    return %c0_i32, %c0_i32_0 : i32, i32
  }
  func.func @transform_2(%arg0: i32) -> (i32, i32) {
    %c0_i32 = arith.constant 0 : i32
    %c0_i32_0 = arith.constant 0 : i32
    %c0_i32_1 = arith.constant 0 : i32
    return %c0_i32, %c0_i32_0 : i32, i32
  }
  func.func @transform_3(%arg0: i32) -> (i32, i32) {
    %c0_i32 = arith.constant 0 : i32
    %c0_i32_0 = arith.constant 0 : i32
    %c0_i32_1 = arith.constant 0 : i32
    return %c0_i32, %c0_i32_0 : i32, i32
  }
  func.func @transform_4(%arg0: i32) -> (i32, i32) {
    %c0_i32 = arith.constant 0 : i32
    %c0_i32_0 = arith.constant 0 : i32
    %c0_i32_1 = arith.constant 0 : i32
    return %c0_i32, %c0_i32_0 : i32, i32
  }
  func.func @transform_5(%arg0: i32) -> (i32, i32) {
    %c0_i32 = arith.constant 0 : i32
    %c0_i32_0 = arith.constant 0 : i32
    return %arg0, %c0_i32 : i32, i32
  }
}

</mosaic_0001>

<bundles_post_ra>
// kernel: net_forward.1
= control target key start
LH: loop header
LB: loop body
LE: loop exit
PB: predicated region body
PF: predicated region fallthrough
CT: control target
= control target key end

     0   :  { %10 = vsyncpa [#allocation3], 0  ;;  %s436_s0 = inlined_call_operand.hbm [shape: f32[8,6], index: 0, kind: input, shape index: {}]   ;;  %s437_s1 = inlined_call_operand.hbm [shape: f32[6,128], index: 1, kind: input, shape index: {}]   ;;  %s438_s2 = inlined_call_operand.vmem [shape: f32[1,128], index: 2, kind: input, shape index: {}]   ;;  %s439_s3 = inlined_call_operand.hbm [shape: f32[128,128], index: 3, kind: input, shape index: {}]   ;;  %s440_s4 = inlined_call_operand.vmem [shape: f32[1,4], index: 4, kind: input, shape index: {}]   ;;  %s441_s5 = inlined_call_operand.vmem [shape: f32[8,4], index: 5, kind: output, shape index: {}]  }
   0x1   :  { %11 = vsyncpa [#allocation5], 0  ;;  %s381_s18 = smov [#allocation4]   ;;  %s382_s20 = smov [#allocation2]  }
   0x2   :  { %s28_s19 = sshll.u32 %s381_s18, 4  ;;  %s18_s21 = sshll.u32 %s382_s20, 4  ;;  %s29_s19 = int_to_ptr.vmem [resolvable:$true] %s28_s19  ;;  %s19_s21 = int_to_ptr.vmem [resolvable:$true] %s18_s21 }
   0x3   :  { %s325_s22 = scalar_lea.vmem %s29_s19, 128  ;;  %p330_p1 = scmp.lt.s32.totalorder %s29_s19, %s29_s19 }
   0x4   :  { %p326_p0 = scmp.ne.s32.totalorder %s29_s19, %s325_s22  ;;  %p331_p2 = scmp.lt.s32.totalorder %s325_s22, %s325_s22 }
   0x6   :  { %p332_p3 = por %p331_p2, %p330_p1 }
   0x8   :  { %p333_p4 = pnand %p332_p3, %p326_p0 }
   0xa   :  { %336 = shalt.err (!%p333_p4)
}
   0xb   :  { %31 = dma.hbm_to_vmem [thread:$0]  %s437_s1, 128, %s29_s19, [#allocation5]  }
   0xc   :  { %s345_s25 = scalar_lea.vmem %s19_s21, 128  ;;  %p350_p6 = scmp.lt.s32.totalorder %s19_s21, %s19_s21 }
   0xd   :  { %p346_p5 = scmp.ne.s32.totalorder %s19_s21, %s345_s25  ;;  %p351_p7 = scmp.lt.s32.totalorder %s345_s25, %s345_s25 }
   0xf   :  { %p352_p8 = por %p351_p7, %p350_p6 }
  0x11   :  { %p353_p9 = pnand %p352_p8, %p346_p5 }
  0x13   :  { %356 = shalt.err (!%p353_p9)
}
  0x14   :  { %21 = dma.hbm_to_vmem [thread:$0]  %s436_s0, 128, %s19_s21, [#allocation3]  }
  0x15   :  { %s383_s28 = smov [#allocation6]  }
  0x16   :  { %s39_s29 = sshll.u32 %s383_s28, 4  ;;  %s40_s29 = int_to_ptr.vmem [resolvable:$true] %s39_s29 }
  0x17   :  { %s365_s30 = scalar_lea.vmem %s40_s29, 2048  ;;  %p370_p11 = scmp.lt.s32.totalorder %s40_s29, %s40_s29 }
  0x18   :  { %p366_p10 = scmp.ne.s32.totalorder %s40_s29, %s365_s30  ;;  %p371_p12 = scmp.lt.s32.totalorder %s365_s30, %s365_s30 }
  0x1a   :  { %p372_p13 = por %p371_p12, %p370_p11 }
  0x1c   :  { %p373_p0 = pnand %p372_p13, %p366_p10 }
  0x1e   :  { %376 = shalt.err (!%p373_p0)
}
  0x1f   :  { %s384_s1 = smov 128   ;;  %s385_s6 = smov 8  }
  0x20   :  { %45 = dma.hbm_to_vmem [thread:$0]  %s439_s3, 2048, %s40_s29, [#allocation5], %s384_s1, %s384_s1, %s385_s6  }
  0x21   :  { %377 = dma.done.wait [#allocation3], 128  }
  0x22   :  { %378 = vsyncadd [#allocation3], 4294967168 }
  0x23   :  { %379 = dma.done.wait [#allocation5], 2176  }
  0x24   :  { %380 = vsyncadd [#allocation5], 4294965120  ;;  %v386_v0 = vmov 0.0   ;;  %vm387_vm0 = vmmov 0   ;;  %vm70_vm1 = vcmask 1045504   ;;  %vm66_vm2 = vcmask 48128  }
  0x25   :  { %270 = vmatprep.subr.mxu0 %v386_v0  ;;  %272 = vmatprep.mubr.msk.f32.mxu0 %vm387_vm0, %v386_v0  ;;  %v58_v1 = vld [vmem:[#allocation4] sm:$0x3f]  ;;  %v57_v2 = vld [vmem:[#allocation2] sm:$0xff]  ;;  %v158_v5 = vld [vmem:[#allocation6 + $0x68] sm:$0xff]  ;;  %vm239_vm3 = vcmask 31744  }
  0x26   :  { %275 = vmatprep.subr.mxu1 %v386_v0  ;;  %307 = vmatprep.mubr.msk.f32.mxu1 %vm387_vm0, %v386_v0  ;;  %v160_v3 = vld [vmem:[#allocation6 + $0x78] sm:$0xff]  ;;  %v159_v4 = vld [vmem:[#allocation6 + $0x70] sm:$0xff]  ;;  %v157_v6 = vld [vmem:[#allocation6 + $0x60] sm:$0xff] }
  0x27   :  { %271 = vmatpush3.msk.msra.mxu0 %vm70_vm1, %v58_v1  ;;  %276 = vmatpush3.msra.mxu1 %v160_v3  ;;  %v156_v7 = vld [vmem:[#allocation6 + $0x58] sm:$0xff]  ;;  %v155_v8 = vld [vmem:[#allocation6 + $0x50] sm:$0xff]  ;;  %v154_v9 = vld [vmem:[#allocation6 + $0x48] sm:$0xff] }
  0x28   :  { %273 = vmatmul.mubr.msk.f32.vlgmr.msra.gmra.mxu0 %vm66_vm2, %v57_v2  ;;  %277 = vmatprep.subr.mxu1 %v386_v0  ;;  %v153_v10 = vld [vmem:[#allocation6 + $0x40] sm:$0xff]  ;;  %v152_v11 = vld [vmem:[#allocation6 + $0x38] sm:$0xff]  ;;  %v151_v12 = vld [vmem:[#allocation6 + $0x30] sm:$0xff] }
  0x29   :  { %278 = vmatpush3.msra.mxu1 %v159_v4  ;;  %v150_v13 = vld [vmem:[#allocation6 + $0x28] sm:$0xff]  ;;  %v149_v14 = vld [vmem:[#allocation6 + $0x20] sm:$0xff]  ;;  %v148_v15 = vld [vmem:[#allocation6 + $0x18] sm:$0xff] }
  0x2a   :  { %279 = vmatprep.subr.mxu1 %v386_v0  ;;  %v147_v16 = vld [vmem:[#allocation6 + $0x10] sm:$0xff]  ;;  %v146_v17 = vld [vmem:[#allocation6 + $0x8] sm:$0xff]  ;;  %v145_v18 = vld [vmem:[#allocation6] sm:$0xff] }
  0x2b   :  { %280 = vmatpush3.msra.mxu1 %v158_v5  ;;  %v247_v19 = vld [vmem:[%s438_s2] ss:$0 sm:$0xff] }
  0x2c   :  { %281 = vmatprep.subr.mxu1 %v386_v0  ;;  %v250_v24 = vld [vmem:[%s440_s4] ss:$0 sm:$0xff] }
  0x2d   :  { %282 = vmatpush3.msra.mxu1 %v157_v6 }
  0x2e   :  { %283 = vmatprep.subr.mxu1 %v386_v0 }
  0x2f   :  { %284 = vmatpush3.msra.mxu1 %v156_v7 }
  0x30   :  { %285 = vmatprep.subr.mxu1 %v386_v0 }
  0x31   :  { %286 = vmatpush3.msra.mxu1 %v155_v8 }
  0x32   :  { %287 = vmatprep.subr.mxu1 %v386_v0 }
  0x33   :  { %288 = vmatpush3.msra.mxu1 %v154_v9 }
  0x34   :  { %289 = vmatprep.subr.mxu1 %v386_v0 }
  0x35   :  { %290 = vmatpush3.msra.mxu1 %v153_v10 }
  0x36   :  { %291 = vmatprep.subr.mxu1 %v386_v0 }
  0x37   :  { %292 = vmatpush3.msra.mxu1 %v152_v11 }
  0x38   :  { %293 = vmatprep.subr.mxu1 %v386_v0 }
  0x39   :  { %294 = vmatpush3.msra.mxu1 %v151_v12 }
  0x3a   :  { %295 = vmatprep.subr.mxu1 %v386_v0 }
  0x3b   :  { %296 = vmatpush3.msra.mxu1 %v150_v13 }
  0x3c   :  { %297 = vmatprep.subr.mxu1 %v386_v0 }
  0x3d   :  { %298 = vmatpush3.msra.mxu1 %v149_v14 }
  0x3e   :  { %299 = vmatprep.subr.mxu1 %v386_v0 }
  0x3f   :  { %300 = vmatpush3.msra.mxu1 %v148_v15 }
  0x40   :  { %301 = vmatprep.subr.mxu1 %v386_v0 }
  0x41   :  { %302 = vmatpush3.msra.mxu1 %v147_v16 }
  0x42   :  { %303 = vmatprep.subr.mxu1 %v386_v0 }
  0x43   :  { %304 = vmatpush3.msra.mxu1 %v146_v17 }
  0x44   :  { %305 = vmatprep.subr.mxu1 %v386_v0 }
  0x45   :  { %306 = vmatpush3.msra.mxu1 %v145_v18 }
  0xe8   :  { %v140_v20 = vpop.f32.mrf.mxu0 }
  0xe9   :  { %v141_v21 = vadd.f32 %v247_v19, %v140_v20 }
  0xea   :  { %v274_v22 = vpop.f32.mrf.mxu0 }
  0xeb   :  { %v144_v23 = vmax.f32 %v141_v21, 0.0 }
  0xed   :  { %308 = vmatmul.mubr.f32.vlgmr.msra.gmra.mxu1 %v144_v23 }
 0x1ad   :  { %v227_v25 = vpop.f32.mrf.mxu1 }
 0x1ae   :  { %v238_v26 = vadd.f32 %v250_v24, %v227_v25 }
 0x1af   :  { %v309_v27 = vpop.f32.mrf.mxu1 }
 0x1b0   :  { %240 = vst.msk [vmem:[%s441_s5] sm:$0xff] %vm239_vm3, %v238_v26 }
 0x1b1   :  { %245 = vsyncpa [#allocation3], 1 }
 0x1b2   :  { %246 = vsyncpa [#allocation5], 1 }

</bundles_post_ra>
